<compile_context>
chip_gen: v7x
topology: tpu7x:2x2x1
jax: 0.10.0
libtpu: 0.0.40
codegen_flags: <defaults>
</compile_context>

<pallas_src>
import functools
import math

import jax
import jax.numpy as jnp
import numpy as np
from jax.experimental import pallas as pl
from jax.experimental.pallas import tpu as pltpu


def temporal_positional_weight(input_size: int, feature_size: int) -> jnp.ndarray:
    """Exact replica of TemporalPositional.__init__ weight construction."""
    weight = jnp.zeros((input_size, feature_size), dtype=jnp.float32)
    position = jnp.arange(0, input_size, dtype=jnp.float32)[:, None]          # (N, 1)
    div_term = jnp.exp(
        jnp.arange(0, feature_size, 2, dtype=jnp.float32)
        * -(math.log(10000.0) / feature_size)
    )                                                                          # (F//2,)
    sin_part = jnp.sin(position * div_term)                                    # (N, F//2)
    cos_part = jnp.cos(position * div_term)                                    # (N, F//2)
    # weight[:, 0:2] = sin(...)   (broadcasts (N,1) -> (N,2) when F == 2)
    weight = weight.at[:, 0:2].set(
        jnp.broadcast_to(sin_part, (input_size, weight[:, 0:2].shape[1]))
    )
    # weight[:, 1:2] = cos(...)
    weight = weight.at[:, 1:2].set(cos_part)
    return weight


def _gather_butterfly_kernel(tbl_ref, idx_ref, out_ref):
    """Planar tiny-vocab gather: out[f, r, l] = tbl[idx[r, l], f].

    tbl_ref: (V, F) f32 in SMEM  -- embedding table (scalar reads, splat per block).
    idx_ref: (blk_r, 128) int32  -- un-repeated, lane-dense packed indices.
    out_ref: (F, blk_r, 128) f32 -- per-feature planes, full-vreg unmasked stores.
    """
    V, F = tbl_ref.shape
    v_pow2 = pl.next_power_of_2(V)                 # static Python int
    nbits = max(v_pow2.bit_length() - 1, 0)

    idx = idx_ref[...]                             # (blk_r, 128) int32
    # Per-bit masks of the index value; shared across all features (pure VPU).
    bits = [(idx & (1 << b)) != 0 for b in range(nbits)]

    for f in range(F):
        def build(lo, hi):
            """Depth-first select butterfly over table rows [lo, hi)."""
            if hi - lo == 1:
                # Leaf: scalar table entry (0.0 for power-of-two padding rows).
                return tbl_ref[lo, f] if lo < V else jnp.float32(0.0)
            mid = (lo + hi) // 2
            b = (hi - lo).bit_length() - 2         # bit separating the halves
            left = build(lo, mid)
            right = build(mid, hi)
            return jnp.where(bits[b], right, left)

        plane = build(0, v_pow2)
        if nbits == 0:                             # V == 1: plane is a scalar
            plane = jnp.full(idx.shape, plane, dtype=jnp.float32)
        out_ref[f, :, :] = plane


def _choose_tiling(num_packed_rows: int, max_block_rows: int):
    """Pick (blk_r, num_tiles, padded_rows) with blk_r a multiple of 8."""
    max_blk = max(8, (max_block_rows // 8) * 8)
    num_tiles = pl.cdiv(num_packed_rows, max_blk)
    # Keep >= 2 grid steps when there is enough work, so "parallel" can shard
    # across v7x's two TensorCores.
    if num_tiles == 1 and num_packed_rows >= 16:
        num_tiles = 2
    blk_r = pl.cdiv(num_packed_rows, num_tiles)
    blk_r = ((blk_r + 7) // 8) * 8
    rows_pad = blk_r * num_tiles
    return blk_r, num_tiles, rows_pad


@functools.partial(jax.jit, static_argnames=("max_block_rows",))
def temporal_positional_forward(
    x: jnp.ndarray, weight: jnp.ndarray, *, max_block_rows: int = 1024
) -> jnp.ndarray:
    """Forward pass: out[b, s, :] = weight[x[b, s], :]  (nn.Embedding lookup).

    max_block_rows = packed (128-index) rows per grid step.  1024 rows keeps
    double-buffers + elementwise temporaries well under the 32 MiB scoped-VMEM
    default on every chip (incl. v7x); raise it (with vmem_limit_bytes) for even
    fewer grid steps on very large inputs.
    """
    B, S = x.shape
    V, F = weight.shape
    n = B * S

    num_rows = pl.cdiv(n, 128)                     # packed index rows
    blk_r, num_tiles, rows_pad = _choose_tiling(num_rows, max_block_rows)
    n_pad = rows_pad * 128

    # Layout plumbing (fused under jit): flatten, pad with index 0 (padded
    # outputs are sliced away below), pack 128 indices per lane-dense row.
    idx_flat = x.reshape(-1).astype(jnp.int32)
    idx_flat = jnp.pad(idx_flat, (0, n_pad - n))
    idx_packed = idx_flat.reshape(rows_pad, 128)

    out_planar = pl.pallas_call(
        _gather_butterfly_kernel,
        out_shape=jax.ShapeDtypeStruct((F, rows_pad, 128), jnp.float32),
        grid=(num_tiles,),
        in_specs=[
            pl.BlockSpec(memory_space=pltpu.MemorySpace.SMEM),   # (V, F) table
            pl.BlockSpec((blk_r, 128), lambda i: (i, 0)),        # packed indices
        ],
        out_specs=pl.BlockSpec((F, blk_r, 128), lambda i: (0, i, 0)),
        compiler_params=pltpu.CompilerParams(
            dimension_semantics=("parallel",),                   # independent tiles
        ),
    )(weight.astype(jnp.float32), idx_packed)

    # Feature interleave back to (B, S, F): one fused slice+transpose under jit.
    out = out_planar.reshape(F, n_pad)[:, :n].T                  # (n, F)
    return out.reshape(B, S, F)


if __name__ == "__main__":
    input_size = 16    # number of positions (embedding rows)
    feature_size = 2   # forced by the reference __init__ quirk (see header NOTE)

    weight = temporal_positional_weight(input_size, feature_size)
    k1, k2, k3 = jax.random.split(jax.random.PRNGKey(0), 3)

    # Small shape matching the module's intended use (single-tile path).
    B, S = 2, 8
    x = jax.random.randint(k1, (B, S), minval=0, maxval=input_size, dtype=jnp.int32)
    out = jax.block_until_ready(temporal_positional_forward(x, weight))
    ref = jnp.take(weight, x, axis=0)
    np.testing.assert_allclose(np.asarray(out), np.asarray(ref), rtol=1e-6, atol=1e-6)
    assert out.shape == (B, S, feature_size)
    assert out.dtype == jnp.float32

    # Multi-tile, pipelined path (grid == 2, exercises megacore-style sharding).
    B2, S2 = 2, 1024
    x2 = jax.random.randint(k2, (B2, S2), minval=0, maxval=input_size, dtype=jnp.int32)
    out2 = jax.block_until_ready(
        temporal_positional_forward(x2, weight, max_block_rows=8)
    )
    ref2 = jnp.take(weight, x2, axis=0)
    np.testing.assert_allclose(np.asarray(out2), np.asarray(ref2), rtol=1e-6, atol=1e-6)
    assert out2.shape == (B2, S2, feature_size)

    # Ragged size (n not a multiple of 128) with a multi-tile grid.
    B3, S3 = 5, 999
    x3 = jax.random.randint(k3, (B3, S3), minval=0, maxval=input_size, dtype=jnp.int32)
    out3 = jax.block_until_ready(
        temporal_positional_forward(x3, weight, max_block_rows=16)
    )
    ref3 = jnp.take(weight, x3, axis=0)
    np.testing.assert_allclose(np.asarray(out3), np.asarray(ref3), rtol=1e-6, atol=1e-6)
    assert out3.shape == (B3, S3, feature_size)

    print("KERNEL_OK")
</pallas_src>

<mosaic_0001>
module attributes {stable_mosaic.version = 11 : i64} {
  func.func @_gather_butterfly_kernel(%arg0: i32, %arg1: memref<16x2xf32, #tpu.memory_space<smem>>, %arg2: memref<8x128xi32, #tpu.memory_space<vmem>>, %arg3: memref<2x8x128xf32, #tpu.memory_space<vmem>>) attributes {dimension_semantics = [#tpu.dimension_semantics<parallel>], iteration_bounds = array<i64: 1>, scalar_prefetch = 0 : i64, scratch_operands = 0 : i64, tpu.core_type = #tpu.core_type<tc>, window_params = [{transform_indices = @transform_0, window_bounds = array<i64: 16, 2>}, {transform_indices = @transform_1, window_bounds = array<i64: 8, 128>}, {transform_indices = @transform_2, window_bounds = array<i64: 2, 8, 128>}]} {
    %c0 = arith.constant 0 : index
    %c0_0 = arith.constant 0 : index
    %0 = vector.load %arg2[%c0, %c0_0] : memref<8x128xi32, #tpu.memory_space<vmem>>, vector<8x128xi32>
    %c1_i32 = arith.constant 1 : i32
    %1 = vector.broadcast %c1_i32 : i32 to vector<8x128xi32>
    %2 = arith.andi %0, %1 : vector<8x128xi32>
    %c0_i32 = arith.constant 0 : i32
    %3 = vector.broadcast %c0_i32 : i32 to vector<8x128xi32>
    %4 = arith.cmpi ne, %2, %3 : vector<8x128xi32>
    %c2_i32 = arith.constant 2 : i32
    %5 = vector.broadcast %c2_i32 : i32 to vector<8x128xi32>
    %6 = arith.andi %0, %5 : vector<8x128xi32>
    %c0_i32_1 = arith.constant 0 : i32
    %7 = vector.broadcast %c0_i32_1 : i32 to vector<8x128xi32>
    %8 = arith.cmpi ne, %6, %7 : vector<8x128xi32>
    %c4_i32 = arith.constant 4 : i32
    %9 = vector.broadcast %c4_i32 : i32 to vector<8x128xi32>
    %10 = arith.andi %0, %9 : vector<8x128xi32>
    %c0_i32_2 = arith.constant 0 : i32
    %11 = vector.broadcast %c0_i32_2 : i32 to vector<8x128xi32>
    %12 = arith.cmpi ne, %10, %11 : vector<8x128xi32>
    %c8_i32 = arith.constant 8 : i32
    %13 = vector.broadcast %c8_i32 : i32 to vector<8x128xi32>
    %14 = arith.andi %0, %13 : vector<8x128xi32>
    %c0_i32_3 = arith.constant 0 : i32
    %15 = vector.broadcast %c0_i32_3 : i32 to vector<8x128xi32>
    %16 = arith.cmpi ne, %14, %15 : vector<8x128xi32>
    %c0_4 = arith.constant 0 : index
    %c0_5 = arith.constant 0 : index
    %17 = memref.load %arg1[%c0_4, %c0_5] : memref<16x2xf32, #tpu.memory_space<smem>>
    %c1 = arith.constant 1 : index
    %c0_6 = arith.constant 0 : index
    %18 = memref.load %arg1[%c1, %c0_6] : memref<16x2xf32, #tpu.memory_space<smem>>
    %19 = vector.broadcast %18 : f32 to vector<8x128xf32>
    %20 = vector.broadcast %17 : f32 to vector<8x128xf32>
    %21 = arith.select %4, %19, %20 : vector<8x128xi1>, vector<8x128xf32>
    %c2 = arith.constant 2 : index
    %c0_7 = arith.constant 0 : index
    %22 = memref.load %arg1[%c2, %c0_7] : memref<16x2xf32, #tpu.memory_space<smem>>
    %c3 = arith.constant 3 : index
    %c0_8 = arith.constant 0 : index
    %23 = memref.load %arg1[%c3, %c0_8] : memref<16x2xf32, #tpu.memory_space<smem>>
    %24 = vector.broadcast %23 : f32 to vector<8x128xf32>
    %25 = vector.broadcast %22 : f32 to vector<8x128xf32>
    %26 = arith.select %4, %24, %25 : vector<8x128xi1>, vector<8x128xf32>
    %27 = arith.select %8, %26, %21 : vector<8x128xi1>, vector<8x128xf32>
    %c4 = arith.constant 4 : index
    %c0_9 = arith.constant 0 : index
    %28 = memref.load %arg1[%c4, %c0_9] : memref<16x2xf32, #tpu.memory_space<smem>>
    %c5 = arith.constant 5 : index
    %c0_10 = arith.constant 0 : index
    %29 = memref.load %arg1[%c5, %c0_10] : memref<16x2xf32, #tpu.memory_space<smem>>
    %30 = vector.broadcast %29 : f32 to vector<8x128xf32>
    %31 = vector.broadcast %28 : f32 to vector<8x128xf32>
    %32 = arith.select %4, %30, %31 : vector<8x128xi1>, vector<8x128xf32>
    %c6 = arith.constant 6 : index
    %c0_11 = arith.constant 0 : index
    %33 = memref.load %arg1[%c6, %c0_11] : memref<16x2xf32, #tpu.memory_space<smem>>
    %c7 = arith.constant 7 : index
    %c0_12 = arith.constant 0 : index
    %34 = memref.load %arg1[%c7, %c0_12] : memref<16x2xf32, #tpu.memory_space<smem>>
    %35 = vector.broadcast %34 : f32 to vector<8x128xf32>
    %36 = vector.broadcast %33 : f32 to vector<8x128xf32>
    %37 = arith.select %4, %35, %36 : vector<8x128xi1>, vector<8x128xf32>
    %38 = arith.select %8, %37, %32 : vector<8x128xi1>, vector<8x128xf32>
    %39 = arith.select %12, %38, %27 : vector<8x128xi1>, vector<8x128xf32>
    %c8 = arith.constant 8 : index
    %c0_13 = arith.constant 0 : index
    %40 = memref.load %arg1[%c8, %c0_13] : memref<16x2xf32, #tpu.memory_space<smem>>
    %c9 = arith.constant 9 : index
    %c0_14 = arith.constant 0 : index
    %41 = memref.load %arg1[%c9, %c0_14] : memref<16x2xf32, #tpu.memory_space<smem>>
    %42 = vector.broadcast %41 : f32 to vector<8x128xf32>
    %43 = vector.broadcast %40 : f32 to vector<8x128xf32>
    %44 = arith.select %4, %42, %43 : vector<8x128xi1>, vector<8x128xf32>
    %c10 = arith.constant 10 : index
    %c0_15 = arith.constant 0 : index
    %45 = memref.load %arg1[%c10, %c0_15] : memref<16x2xf32, #tpu.memory_space<smem>>
    %c11 = arith.constant 11 : index
    %c0_16 = arith.constant 0 : index
    %46 = memref.load %arg1[%c11, %c0_16] : memref<16x2xf32, #tpu.memory_space<smem>>
    %47 = vector.broadcast %46 : f32 to vector<8x128xf32>
    %48 = vector.broadcast %45 : f32 to vector<8x128xf32>
    %49 = arith.select %4, %47, %48 : vector<8x128xi1>, vector<8x128xf32>
    %50 = arith.select %8, %49, %44 : vector<8x128xi1>, vector<8x128xf32>
    %c12 = arith.constant 12 : index
    %c0_17 = arith.constant 0 : index
    %51 = memref.load %arg1[%c12, %c0_17] : memref<16x2xf32, #tpu.memory_space<smem>>
    %c13 = arith.constant 13 : index
    %c0_18 = arith.constant 0 : index
    %52 = memref.load %arg1[%c13, %c0_18] : memref<16x2xf32, #tpu.memory_space<smem>>
    %53 = vector.broadcast %52 : f32 to vector<8x128xf32>
    %54 = vector.broadcast %51 : f32 to vector<8x128xf32>
    %55 = arith.select %4, %53, %54 : vector<8x128xi1>, vector<8x128xf32>
    %c14 = arith.constant 14 : index
    %c0_19 = arith.constant 0 : index
    %56 = memref.load %arg1[%c14, %c0_19] : memref<16x2xf32, #tpu.memory_space<smem>>
    %c15 = arith.constant 15 : index
    %c0_20 = arith.constant 0 : index
    %57 = memref.load %arg1[%c15, %c0_20] : memref<16x2xf32, #tpu.memory_space<smem>>
    %58 = vector.broadcast %57 : f32 to vector<8x128xf32>
    %59 = vector.broadcast %56 : f32 to vector<8x128xf32>
    %60 = arith.select %4, %58, %59 : vector<8x128xi1>, vector<8x128xf32>
    %61 = arith.select %8, %60, %55 : vector<8x128xi1>, vector<8x128xf32>
    %62 = arith.select %12, %61, %50 : vector<8x128xi1>, vector<8x128xf32>
    %63 = arith.select %16, %62, %39 : vector<8x128xi1>, vector<8x128xf32>
    %c0_21 = arith.constant 0 : index
    %c0_22 = arith.constant 0 : index
    %c0_23 = arith.constant 0 : index
    %64 = vector.load %arg3[%c0_21, %c0_22, %c0_23] : memref<2x8x128xf32, #tpu.memory_space<vmem>>, vector<1x8x128xf32>
    %65 = vector.shape_cast %64 : vector<1x8x128xf32> to vector<8x128xf32>
    %66 = vector.shape_cast %63 : vector<8x128xf32> to vector<1x8x128xf32>
    tpu.vector_store %arg3[%c0_21, %c0_22, %c0_23], %66 {strides = array<i32>} : memref<2x8x128xf32, #tpu.memory_space<vmem>>, vector<1x8x128xf32>,
    %c0_24 = arith.constant 0 : index
    %c1_25 = arith.constant 1 : index
    %67 = memref.load %arg1[%c0_24, %c1_25] : memref<16x2xf32, #tpu.memory_space<smem>>
    %c1_26 = arith.constant 1 : index
    %c1_27 = arith.constant 1 : index
    %68 = memref.load %arg1[%c1_26, %c1_27] : memref<16x2xf32, #tpu.memory_space<smem>>
    %69 = vector.broadcast %68 : f32 to vector<8x128xf32>
    %70 = vector.broadcast %67 : f32 to vector<8x128xf32>
    %71 = arith.select %4, %69, %70 : vector<8x128xi1>, vector<8x128xf32>
    %c2_28 = arith.constant 2 : index
    %c1_29 = arith.constant 1 : index
    %72 = memref.load %arg1[%c2_28, %c1_29] : memref<16x2xf32, #tpu.memory_space<smem>>
    %c3_30 = arith.constant 3 : index
    %c1_31 = arith.constant 1 : index
    %73 = memref.load %arg1[%c3_30, %c1_31] : memref<16x2xf32, #tpu.memory_space<smem>>
    %74 = vector.broadcast %73 : f32 to vector<8x128xf32>
    %75 = vector.broadcast %72 : f32 to vector<8x128xf32>
    %76 = arith.select %4, %74, %75 : vector<8x128xi1>, vector<8x128xf32>
    %77 = arith.select %8, %76, %71 : vector<8x128xi1>, vector<8x128xf32>
    %c4_32 = arith.constant 4 : index
    %c1_33 = arith.constant 1 : index
    %78 = memref.load %arg1[%c4_32, %c1_33] : memref<16x2xf32, #tpu.memory_space<smem>>
    %c5_34 = arith.constant 5 : index
    %c1_35 = arith.constant 1 : index
    %79 = memref.load %arg1[%c5_34, %c1_35] : memref<16x2xf32, #tpu.memory_space<smem>>
    %80 = vector.broadcast %79 : f32 to vector<8x128xf32>
    %81 = vector.broadcast %78 : f32 to vector<8x128xf32>
    %82 = arith.select %4, %80, %81 : vector<8x128xi1>, vector<8x128xf32>
    %c6_36 = arith.constant 6 : index
    %c1_37 = arith.constant 1 : index
    %83 = memref.load %arg1[%c6_36, %c1_37] : memref<16x2xf32, #tpu.memory_space<smem>>
    %c7_38 = arith.constant 7 : index
    %c1_39 = arith.constant 1 : index
    %84 = memref.load %arg1[%c7_38, %c1_39] : memref<16x2xf32, #tpu.memory_space<smem>>
    %85 = vector.broadcast %84 : f32 to vector<8x128xf32>
    %86 = vector.broadcast %83 : f32 to vector<8x128xf32>
    %87 = arith.select %4, %85, %86 : vector<8x128xi1>, vector<8x128xf32>
    %88 = arith.select %8, %87, %82 : vector<8x128xi1>, vector<8x128xf32>
    %89 = arith.select %12, %88, %77 : vector<8x128xi1>, vector<8x128xf32>
    %c8_40 = arith.constant 8 : index
    %c1_41 = arith.constant 1 : index
    %90 = memref.load %arg1[%c8_40, %c1_41] : memref<16x2xf32, #tpu.memory_space<smem>>
    %c9_42 = arith.constant 9 : index
    %c1_43 = arith.constant 1 : index
    %91 = memref.load %arg1[%c9_42, %c1_43] : memref<16x2xf32, #tpu.memory_space<smem>>
    %92 = vector.broadcast %91 : f32 to vector<8x128xf32>
    %93 = vector.broadcast %90 : f32 to vector<8x128xf32>
    %94 = arith.select %4, %92, %93 : vector<8x128xi1>, vector<8x128xf32>
    %c10_44 = arith.constant 10 : index
    %c1_45 = arith.constant 1 : index
    %95 = memref.load %arg1[%c10_44, %c1_45] : memref<16x2xf32, #tpu.memory_space<smem>>
    %c11_46 = arith.constant 11 : index
    %c1_47 = arith.constant 1 : index
    %96 = memref.load %arg1[%c11_46, %c1_47] : memref<16x2xf32, #tpu.memory_space<smem>>
    %97 = vector.broadcast %96 : f32 to vector<8x128xf32>
    %98 = vector.broadcast %95 : f32 to vector<8x128xf32>
    %99 = arith.select %4, %97, %98 : vector<8x128xi1>, vector<8x128xf32>
    %100 = arith.select %8, %99, %94 : vector<8x128xi1>, vector<8x128xf32>
    %c12_48 = arith.constant 12 : index
    %c1_49 = arith.constant 1 : index
    %101 = memref.load %arg1[%c12_48, %c1_49] : memref<16x2xf32, #tpu.memory_space<smem>>
    %c13_50 = arith.constant 13 : index
    %c1_51 = arith.constant 1 : index
    %102 = memref.load %arg1[%c13_50, %c1_51] : memref<16x2xf32, #tpu.memory_space<smem>>
    %103 = vector.broadcast %102 : f32 to vector<8x128xf32>
    %104 = vector.broadcast %101 : f32 to vector<8x128xf32>
    %105 = arith.select %4, %103, %104 : vector<8x128xi1>, vector<8x128xf32>
    %c14_52 = arith.constant 14 : index
    %c1_53 = arith.constant 1 : index
    %106 = memref.load %arg1[%c14_52, %c1_53] : memref<16x2xf32, #tpu.memory_space<smem>>
    %c15_54 = arith.constant 15 : index
    %c1_55 = arith.constant 1 : index
    %107 = memref.load %arg1[%c15_54, %c1_55] : memref<16x2xf32, #tpu.memory_space<smem>>
    %108 = vector.broadcast %107 : f32 to vector<8x128xf32>
    %109 = vector.broadcast %106 : f32 to vector<8x128xf32>
    %110 = arith.select %4, %108, %109 : vector<8x128xi1>, vector<8x128xf32>
    %111 = arith.select %8, %110, %105 : vector<8x128xi1>, vector<8x128xf32>
    %112 = arith.select %12, %111, %100 : vector<8x128xi1>, vector<8x128xf32>
    %113 = arith.select %16, %112, %89 : vector<8x128xi1>, vector<8x128xf32>
    %c1_56 = arith.constant 1 : index
    %c0_57 = arith.constant 0 : index
    %c0_58 = arith.constant 0 : index
    %114 = vector.load %arg3[%c1_56, %c0_57, %c0_58] : memref<2x8x128xf32, #tpu.memory_space<vmem>>, vector<1x8x128xf32>
    %115 = vector.shape_cast %114 : vector<1x8x128xf32> to vector<8x128xf32>
    %116 = vector.shape_cast %113 : vector<8x128xf32> to vector<1x8x128xf32>
    tpu.vector_store %arg3[%c1_56, %c0_57, %c0_58], %116 {strides = array<i32>} : memref<2x8x128xf32, #tpu.memory_space<vmem>>, vector<1x8x128xf32>,
    return
  }
  func.func @transform_0(%arg0: i32) -> (i32, i32) {
    %c0_i32 = arith.constant 0 : i32
    %c0_i32_0 = arith.constant 0 : i32
    %c0_i32_1 = arith.constant 0 : i32
    return %c0_i32, %c0_i32_0 : i32, i32
  }
  func.func @transform_1(%arg0: i32) -> (i32, i32) {
    %c0_i32 = arith.constant 0 : i32
    %c0_i32_0 = arith.constant 0 : i32
    return %arg0, %c0_i32 : i32, i32
  }
  func.func @transform_2(%arg0: i32) -> (i32, i32, i32) {
    %c0_i32 = arith.constant 0 : i32
    %c0_i32_0 = arith.constant 0 : i32
    %c0_i32_1 = arith.constant 0 : i32
    return %c0_i32, %arg0, %c0_i32_0 : i32, i32, i32
  }
}

</mosaic_0001>

<bundles_post_ra>
// kernel: temporal_positional_forward.1
= control target key start
LH: loop header
LB: loop body
LE: loop exit
PB: predicated region body
PF: predicated region fallthrough
CT: control target
= control target key end

     0   :  { %7 = vsyncpa [#allocation3], 0  ;;  %s352_s0 = inlined_call_operand.vmem [shape: f32[16,2], index: 0, kind: input, shape index: {}]   ;;  %s353_s1 = inlined_call_operand.vmem [shape: s32[8,128], index: 1, kind: input, shape index: {}]   ;;  %s354_s2 = inlined_call_operand.vmem [shape: f32[2,8,128], index: 2, kind: output, shape index: {}]  }
   0x1   :  { %s13_s11 = sshll.u32 %s352_s0, 4  ;;  %s14_s11 = int_to_ptr.vmem [resolvable:$true] %s13_s11 }
   0x2   :  { %s172_s12 = scalar_lea.vmem %s14_s11, 256  ;;  %p177_p1 = scmp.lt.s32.totalorder %s14_s11, %s14_s11 }
   0x3   :  { %p173_p0 = scmp.ne.s32.totalorder %s14_s11, %s172_s12  ;;  %p178_p2 = scmp.lt.s32.totalorder %s172_s12, %s172_s12 }
   0x5   :  { %p179_p3 = por %p178_p2, %p177_p1 }
   0x7   :  { %p180_p4 = pnand %p179_p3, %p173_p0 }
   0x9   :  { %183 = shalt.err (!%p180_p4)
}
   0xa   :  { %s186_s13 = smov [#allocation2]   ;;  %s187_s14 = smov 128  }
   0xb   :  { %s188_s15 = smov 8  }
   0xc   :  { %19 = dma.vmem_to_smem %s14_s11, 256, %s186_s13, [#allocation3], %s187_s14, %s187_s14, %s188_s15  }
   0xd   :  { %184 = dma.done.wait [#allocation3], 256  }
   0xe   :  { %185 = vsyncadd [#allocation3], 4294967040 }
   0xf   :  { %25 = sfence }
  0x10   :  { %v26_v0 = vld [vmem:[%s353_s1] sm:$0xff]  ;;  %s35_s0 = sld [smem:[#allocation2]]  ;;  %s240_s4 = sld [smem:[#allocation2 + $0x1]] }
  0x11   :  { %s137_s18 = sld [smem:[#allocation2 + $0x80]]  ;;  %v27_v1 = vand.u32 1, %v26_v0  ;;  %v29_v2 = vand.u32 2, %v26_v0  ;;  %v31_v4 = vand.u32 4, %v26_v0  ;;  %v33_v12 = vand.u32 8, %v26_v0  ;;  %s242_s5 = sld [smem:[#allocation2 + $0x81]] }
  0x12   :  { %s138_s19 = sld [smem:[#allocation2 + $0x100]]  ;;  %s251_s6 = sld [smem:[#allocation2 + $0x101]] }
  0x13   :  { %s139_s20 = sld [smem:[#allocation2 + $0x180]]  ;;  %vm212_vm0 = vcmp.ne.s32.totalorder %v27_v1, 0  ;;  %vm228_vm1 = vcmp.ne.s32.totalorder %v29_v2, 0  ;;  %vm244_vm2 = vcmp.ne.s32.totalorder %v31_v4, 0  ;;  %s253_s7 = sld [smem:[#allocation2 + $0x181]]  ;;  %vm275_vm3 = vcmp.ne.s32.totalorder %v33_v12, 0 }
  0x14   :  { %s140_s21 = sld [smem:[#allocation2 + $0x200]]  ;;  %s261_s8 = sld [smem:[#allocation2 + $0x201]] }
  0x15   :  { %s141_s22 = sld [smem:[#allocation2 + $0x280]]  ;;  %s263_s9 = sld [smem:[#allocation2 + $0x281]] }
  0x16   :  { %s210_s23 = sld [smem:[#allocation2 + $0x300]]  ;;  %v38_v6 = vstv %s35_s0  ;;  %s271_s10 = sld [smem:[#allocation2 + $0x301]]  ;;  %v86_v38 = vstv %s240_s4 }
  0x17   :  { %s143_s24 = sld [smem:[#allocation2 + $0x380]]  ;;  %v37_v5 = vstv %s137_s18  ;;  %s273_s11 = sld [smem:[#allocation2 + $0x381]]  ;;  %v85_v37 = vstv %s242_s5 }
  0x18   :  { %s216_s25 = sld [smem:[#allocation2 + $0x400]]  ;;  %v43_v7 = vstv %s138_s19  ;;  %v39_v9 = vsel %vm212_vm0, %v37_v5, %v38_v6  ;;  %s283_s12 = sld [smem:[#allocation2 + $0x401]]  ;;  %v87_v40 = vsel %vm212_vm0, %v85_v37, %v86_v38  ;;  %v91_v42 = vstv %s251_s6 }
  0x19   :  { %s218_s26 = sld [smem:[#allocation2 + $0x480]]  ;;  %v42_v10 = vstv %s139_s20  ;;  %s285_s13 = sld [smem:[#allocation2 + $0x481]]  ;;  %v90_v41 = vstv %s253_s7 }
  0x1a   :  { %s220_s1 = sld [smem:[#allocation2 + $0x500]]  ;;  %v49_v11 = vstv %s140_s21  ;;  %v44_v13 = vsel %vm212_vm0, %v42_v10, %v43_v7  ;;  %s293_s14 = sld [smem:[#allocation2 + $0x501]]  ;;  %v92_v44 = vsel %vm212_vm0, %v90_v41, %v91_v42  ;;  %v97_v46 = vstv %s261_s8 }
  0x1b   :  { %s222_s27 = sld [smem:[#allocation2 + $0x580]]  ;;  %v48_v14 = vstv %s141_s22  ;;  %v45_v19 = vsel %vm228_vm1, %v44_v13, %v39_v9  ;;  %s163_s15 = sld [smem:[#allocation2 + $0x581]]  ;;  %v96_v45 = vstv %s263_s9  ;;  %v93_v50 = vsel %vm228_vm1, %v92_v44, %v87_v40 }
  0x1c   :  { %s224_s28 = sld [smem:[#allocation2 + $0x600]]  ;;  %v50_v16 = vsel %vm212_vm0, %v48_v14, %v49_v11  ;;  %v54_v18 = vstv %s210_s23  ;;  %s164_s16 = sld [smem:[#allocation2 + $0x601]]  ;;  %v98_v48 = vsel %vm212_vm0, %v96_v45, %v97_v46  ;;  %v102_v51 = vstv %s271_s10 }
  0x1d   :  { %s226_s29 = sld [smem:[#allocation2 + $0x680]]  ;;  %v53_v17 = vstv %s143_s24  ;;  %s165_s17 = sld [smem:[#allocation2 + $0x681]]  ;;  %v101_v49 = vstv %s273_s11 }
  0x1e   :  { %s234_s30 = sld [smem:[#allocation2 + $0x700]]  ;;  %v55_v20 = vsel %vm212_vm0, %v53_v17, %v54_v18  ;;  %v61_v22 = vstv %s216_s25  ;;  %s166_s0 = sld [smem:[#allocation2 + $0x701]]  ;;  %v109_v53 = vstv %s283_s12  ;;  %v103_v54 = vsel %vm212_vm0, %v101_v49, %v102_v51 }
  0x1f   :  { %s236_s3 = sld [smem:[#allocation2 + $0x780]]  ;;  %v60_v21 = vstv %s218_s26  ;;  %v56_v23 = vsel %vm228_vm1, %v55_v20, %v50_v16  ;;  %s167_s18 = sld [smem:[#allocation2 + $0x781]]  ;;  %v108_v52 = vstv %s285_s13  ;;  %v104_v58 = vsel %vm228_vm1, %v103_v54, %v98_v48 }
  0x20   :  { %v62_v24 = vsel %vm212_vm0, %v60_v21, %v61_v22  ;;  %v66_v26 = vstv %s220_s1  ;;  %v57_v35 = vsel %vm244_vm2, %v56_v23, %v45_v19  ;;  %v110_v55 = vsel %vm212_vm0, %v108_v52, %v109_v53 }
  0x21   :  { %v65_v25 = vstv %s222_s27  ;;  %v113_v56 = vstv %s163_s15  ;;  %v114_v57 = vstv %s293_s14  ;;  %v105_v2 = vsel %vm244_vm2, %v104_v58, %v93_v50 }
  0x22   :  { %v67_v28 = vsel %vm212_vm0, %v65_v25, %v66_v26  ;;  %v72_v30 = vstv %s224_s28  ;;  %v115_v59 = vsel %vm212_vm0, %v113_v56, %v114_v57  ;;  %v120_v61 = vstv %s164_s16 }
  0x23   :  { %v71_v29 = vstv %s226_s29  ;;  %v68_v31 = vsel %vm228_vm1, %v67_v28, %v62_v24  ;;  %v119_v60 = vstv %s165_s17  ;;  %v116_v0 = vsel %vm228_vm1, %v115_v59, %v110_v55 }
  0x24   :  { %v73_v32 = vsel %vm212_vm0, %v71_v29, %v72_v30  ;;  %v77_v34 = vstv %s234_s30  ;;  %v121_v62 = vsel %vm212_vm0, %v119_v60, %v120_v61  ;;  %v125_v1 = vstv %s166_s0 }
  0x25   :  { %v76_v33 = vstv %s236_s3  ;;  %v124_v63 = vstv %s167_s18 }
  0x26   :  { %v78_v36 = vsel %vm212_vm0, %v76_v33, %v77_v34  ;;  %v126_v4 = vsel %vm212_vm0, %v124_v63, %v125_v1 }
  0x27   :  { %v79_v39 = vsel %vm228_vm1, %v78_v36, %v73_v32  ;;  %v127_v5 = vsel %vm228_vm1, %v126_v4, %v121_v62 }
  0x28   :  { %v80_v43 = vsel %vm244_vm2, %v79_v39, %v68_v31  ;;  %v128_v6 = vsel %vm244_vm2, %v127_v5, %v116_v0 }
  0x29   :  { %v81_v47 = vsel %vm275_vm3, %v80_v43, %v57_v35  ;;  %v129_v7 = vsel %vm275_vm3, %v128_v6, %v105_v2 }
  0x2a   :  { %82 = vst [vmem:[%s354_s2] sm:$0xff] %v81_v47  ;;  %168 = vst [vmem:[%s354_s2 + $0x8] sm:$0xff] %v129_v7 }
  0x2b   :  { %136 = vsyncpa [#allocation3], 1 }

</bundles_post_ra>
